<compile_context>
chip_gen: v5e
topology: v5e:2x2
jax: 0.10.0
libtpu: 0.0.40
codegen_flags: <defaults>
</compile_context>

<pallas_src>
import jax
import jax.numpy as jnp
from jax.experimental import pallas as pl
from jax.experimental.pallas import tpu as pltpu


def _deepstream_kernel(x_ref, o_ref):
    # x_ref block: (1, C, TN)   o_ref block: (1, 6, TN)
    x = x_ref[0]                                              # (C, TN), one whole-tile load
    row = jax.lax.broadcasted_iota(jnp.int32, x.shape, 0)     # sublane (channel) index
    is_cls = row >= 4

    # Class max over the sublane axis (box rows masked to -inf; stays x.dtype).
    cls_masked = jnp.where(is_cls, x, -jnp.inf)
    scores = jnp.max(cls_masked, axis=0, keepdims=True)       # (1, TN)

    # First-occurrence argmax over class rows only (matches torch.max tie-break).
    # NOTE: all-NaN class columns give label = INT32_MAX cast to float; scores
    # are NaN either way (acceptable for this head).
    big = jnp.iinfo(jnp.int32).max
    labels = jnp.min(jnp.where(is_cls & (x == scores), row - 4, big),
                     axis=0, keepdims=True)                   # (1, TN) int32

    # Direct row-range stores: lane-dense, no concatenate.
    o_ref[0, 0:4, :] = x[0:4, :]                              # boxes (0-aligned rows)
    o_ref[0, 4:5, :] = scores
    # NOTE: exact for f32; with bf16 inputs class ids > 256 lose precision.
    o_ref[0, 5:6, :] = labels.astype(o_ref.dtype)


def deepstream_output(x, *, tile_n=8192):
    """YOLOv5u DeepStreamOutput head.

    x: (B, C, N) float array (channel-first, C = 4 box + num_classes).
    Returns (B, N, 6) = [box(4), score, label] matching the PyTorch module.
    """
    B, C, N = x.shape
    assert C > 4, "expected 4 box channels + at least 1 class channel"

    # Lane tile: multiple of 128, clamped to the (128-rounded) problem size.
    n_aligned = ((N + 127) // 128) * 128
    tile_n = min(tile_n, n_aligned)
    tile_n = ((tile_n + 127) // 128) * 128

    # Non-divisible N handled by Pallas partial blocks (no jnp.pad, no wasted
    # full-tile grid work beyond the single tail tile).
    grid = (B, pl.cdiv(N, tile_n))

    out = pl.pallas_call(
        _deepstream_kernel,
        out_shape=jax.ShapeDtypeStruct((B, 6, N), x.dtype),
        grid_spec=pl.GridSpec(
            grid=grid,
            in_specs=[pl.BlockSpec((1, C, tile_n), lambda b, n: (b, 0, n))],
            out_specs=pl.BlockSpec((1, 6, tile_n), lambda b, n: (b, 0, n)),
        ),
        compiler_params=pltpu.CompilerParams(
            dimension_semantics=("parallel", "parallel")),
    )(x)                                                      # (B, 6, N)

    # Cheap 6-channel glue to the PyTorch channel-last contract.
    # TODO(synk): drop this transpose entirely if the downstream consumer
    # (NMS / top-k) can take channel-first (B, 6, N).
    return jnp.transpose(out, (0, 2, 1))


def _reference(x):
    x_t = jnp.transpose(x, (0, 2, 1))
    boxes = x_t[:, :, :4]
    cls = x_t[:, :, 4:]
    scores = jnp.max(cls, axis=-1, keepdims=True)
    labels = jnp.argmax(cls, axis=-1, keepdims=True).astype(boxes.dtype)
    return jnp.concatenate([boxes, scores, labels], axis=-1)


if __name__ == "__main__":
    key = jax.random.PRNGKey(0)
    # Small YOLOv5u-like shapes: C = 4 box + 12 classes.
    # N=200 exercises the partial (non-128-multiple) tail block;
    # N=256 exercises the exactly-tiled path.
    for (B, C, N) in [(2, 16, 200), (2, 16, 256)]:
        key, sub = jax.random.split(key)
        x = jax.random.normal(sub, (B, C, N), dtype=jnp.float32)

        out = deepstream_output(x)
        out = jax.block_until_ready(out)

        ref = _reference(x)
        assert out.shape == (B, N, 6), out.shape
        assert jnp.allclose(out, ref, atol=1e-6), f"mismatch vs reference at N={N}"

    print("KERNEL_OK")
</pallas_src>

<mosaic_0001>
module attributes {stable_mosaic.version = 11 : i64} {
  func.func @_deepstream_kernel(%arg0: i32, %arg1: i32, %arg2: memref<1x16x256xf32, #tpu.memory_space<vmem>>, %arg3: memref<1x6x256xf32, #tpu.memory_space<vmem>>) attributes {dimension_semantics = [#tpu.dimension_semantics<parallel>, #tpu.dimension_semantics<parallel>], iteration_bounds = array<i64: 2, 1>, scalar_prefetch = 0 : i64, scratch_operands = 0 : i64, tpu.core_type = #tpu.core_type<tc>, window_params = [{transform_indices = @transform_0, window_bounds = array<i64: 1, 16, 256>}, {transform_indices = @transform_1, window_bounds = array<i64: 1, 6, 256>}]} {
    %c0 = arith.constant 0 : index
    %c0_0 = arith.constant 0 : index
    %c0_1 = arith.constant 0 : index
    %0 = vector.load %arg2[%c0, %c0_0, %c0_1] : memref<1x16x256xf32, #tpu.memory_space<vmem>>, vector<1x16x256xf32>
    %1 = vector.shape_cast %0 : vector<1x16x256xf32> to vector<16x256xf32>
    %2 = tpu.iota {dimensions = array<i32: 0>} : vector<16x256xi32>
    %c4_i32 = arith.constant 4 : i32
    %3 = vector.broadcast %c4_i32 : i32 to vector<16x256xi32>
    %4 = arith.cmpi sge, %2, %3 : vector<16x256xi32>
    %cst = arith.constant 0xFF800000 : f32
    %5 = vector.broadcast %cst : f32 to vector<16x256xf32>
    %6 = arith.select %4, %1, %5 : vector<16x256xi1>, vector<16x256xf32>
    %cst_2 = arith.constant dense<0xFF800000> : vector<256xf32>
    %7 = vector.multi_reduction <maximumf>, %6, %cst_2 [0] : vector<16x256xf32> to vector<256xf32>
    %8 = vector.shape_cast %7 : vector<256xf32> to vector<1x256xf32>
    %9 = vector.broadcast %8 : vector<1x256xf32> to vector<16x256xf32>
    %10 = arith.cmpf oeq, %1, %9 : vector<16x256xf32>
    %11 = arith.andi %4, %10 : vector<16x256xi1>
    %c4_i32_3 = arith.constant 4 : i32
    %12 = vector.broadcast %c4_i32_3 : i32 to vector<16x256xi32>
    %13 = arith.subi %2, %12 : vector<16x256xi32>
    %c2147483647_i32 = arith.constant 2147483647 : i32
    %14 = vector.broadcast %c2147483647_i32 : i32 to vector<16x256xi32>
    %15 = arith.select %11, %13, %14 : vector<16x256xi1>, vector<16x256xi32>
    %cst_4 = arith.constant dense<2147483647> : vector<256xi32>
    %16 = vector.multi_reduction <minsi>, %15, %cst_4 [0] : vector<16x256xi32> to vector<256xi32>
    %17 = vector.shape_cast %16 : vector<256xi32> to vector<1x256xi32>
    %18 = vector.extract_strided_slice %1 {offsets = [0, 0], sizes = [4, 256], strides = [1, 1]} : vector<16x256xf32> to vector<4x256xf32>
    %c0_5 = arith.constant 0 : index
    %c0_6 = arith.constant 0 : index
    %c0_7 = arith.constant 0 : index
    %19 = vector.load %arg3[%c0_5, %c0_6, %c0_7] : memref<1x6x256xf32, #tpu.memory_space<vmem>>, vector<1x4x256xf32>
    %20 = vector.shape_cast %19 : vector<1x4x256xf32> to vector<4x256xf32>
    %21 = vector.shape_cast %18 : vector<4x256xf32> to vector<1x4x256xf32>
    tpu.vector_store %arg3[%c0_5, %c0_6, %c0_7], %21 {strides = array<i32>} : memref<1x6x256xf32, #tpu.memory_space<vmem>>, vector<1x4x256xf32>,
    %c0_8 = arith.constant 0 : index
    %c4 = arith.constant 4 : index
    %c0_9 = arith.constant 0 : index
    %22 = vector.load %arg3[%c0_8, %c4, %c0_9] : memref<1x6x256xf32, #tpu.memory_space<vmem>>, vector<1x1x256xf32>
    %23 = vector.shape_cast %22 : vector<1x1x256xf32> to vector<1x256xf32>
    %24 = vector.shape_cast %8 : vector<1x256xf32> to vector<1x1x256xf32>
    tpu.vector_store %arg3[%c0_8, %c4, %c0_9], %24 {strides = array<i32>} : memref<1x6x256xf32, #tpu.memory_space<vmem>>, vector<1x1x256xf32>,
    %25 = arith.sitofp %17 : vector<1x256xi32> to vector<1x256xf32>
    %c0_10 = arith.constant 0 : index
    %c5 = arith.constant 5 : index
    %c0_11 = arith.constant 0 : index
    %26 = vector.load %arg3[%c0_10, %c5, %c0_11] : memref<1x6x256xf32, #tpu.memory_space<vmem>>, vector<1x1x256xf32>
    %27 = vector.shape_cast %26 : vector<1x1x256xf32> to vector<1x256xf32>
    %28 = vector.shape_cast %25 : vector<1x256xf32> to vector<1x1x256xf32>
    tpu.vector_store %arg3[%c0_10, %c5, %c0_11], %28 {strides = array<i32>} : memref<1x6x256xf32, #tpu.memory_space<vmem>>, vector<1x1x256xf32>,
    return
  }
  func.func @transform_0(%arg0: i32, %arg1: i32) -> (i32, i32, i32) {
    %c0_i32 = arith.constant 0 : i32
    %c0_i32_0 = arith.constant 0 : i32
    return %arg0, %c0_i32, %arg1 : i32, i32, i32
  }
  func.func @transform_1(%arg0: i32, %arg1: i32) -> (i32, i32, i32) {
    %c0_i32 = arith.constant 0 : i32
    %c0_i32_0 = arith.constant 0 : i32
    return %arg0, %c0_i32, %arg1 : i32, i32, i32
  }
}

</mosaic_0001>

<bundles_post_ra>
// kernel: tpu_custom_call.1
= control target key start
LH: loop header
LB: loop body
LE: loop exit
PB: predicated region body
PF: predicated region fallthrough
CT: control target
= control target key end

     0   :  { %6 = vsyncpa [#allocation3], 0  ;;  %s628_s0 = inlined_call_operand.hbm [shape: f32[2,16,200], index: 0, kind: input, shape index: {}]   ;;  %s629_s1 = inlined_call_operand.vmem [shape: f32[2,6,200], index: 1, kind: output, shape index: {}]  }
   0x1   :  { %8 = vsyncpa [#allocation3 + $0x1], 0  ;;  %s520_s6 = smov 0   ;;  %s522_s7 = smov 0  }
   0x2   :  { %s524_s8 = smov 0   ;;  %s526_s9 = smov 0  }
   0x3   :  { %s528_s10 = smov 0   ;;  %s530_s11 = smov 0  }
   0x4 LB: > { %s350_s12 = sadd.s32 4294967295, %s506_s11   ;;  %s26_s13 = sadd.s32 1, %s502_s10  ;;  %s506_s11 = sphi %s530_s11, %s14_s11   ;;  %s502_s10 = sphi %s528_s10, %s638_s10   ;;  %s498_s9 = sphi %s526_s9, %s637_s9   ;;  %s494_s8 = sphi %s524_s8, %s636_s8   ;;  %s490_s7 = sphi %s522_s7, %s635_s7   ;;  %s486_s6 = sphi %s520_s6, %s634_s6  }
   0x5   : > { %p28_p0 = scmp.ge.s32.totalorder %s26_s13, 2  ;;  %s35_s14 = sadd.s32 1, %s494_s8 }
   0x6   : > { %p42_p1 = scmp.ne.s32.totalorder %s494_s8, %s490_s7  ;;  %p43_p2 = scmp.eq.s32.totalorder %s506_s11, 0 }
   0x7   : > { %s640_s13 = smov (%p28_p0, %s26_s13), 0  ;;  %p48_p4 = scmp.ne.s32.totalorder %s490_s7, %s486_s6 }
   0x8   : > { %p556_p3 = por %p43_p2, %p42_p1  ;;  %s30_s16 = ssub.s32 %s502_s10, %s640_s13 }
   0x9   : > { %p49_p5 = scmp.eq.s32.totalorder %s350_s12, 0  ;;  %p33_p6 = scmp.eq.s32.totalorder %s30_s16, 0 }
   0xa   : > { %p375_p8 = scmp.lt.s32.totalorder %s506_s11, 2  ;;  %s100_s19 = sand.u32 1, %s494_s8  }
   0xb   : > { %p563_p7 = por %p49_p5, %p48_p4  ;;  %s367_s20 = sshll.u32 %s502_s10, 5 }
   0xc   : > { %s569_s18 = scalar_select %p33_p6, %s494_s8, %s35_s14  }
   0xd   : > { %s354_s21 = sshll.u32 %s100_s19, 5  ;;  %s111_s24 = scalar_lea.hbm %s628_s0, %s367_s20 }
   0xe   : > { %s112_s25 = sshll.u32 %s111_s24, 4  ;;  %s104_s26 = scalar_lea.vmem [#allocation2], %s354_s21  ;;  %s113_s25 = int_to_ptr.hbm [resolvable:$true] %s112_s25 }
   0xf   : > { %s114_s27 = sshll.u32 %s104_s26, 4  ;;  %p372_p9 = pnand %p375_p8, %p556_p3  ;;  %s115_s27 = int_to_ptr.vmem [resolvable:$true] %s114_s27 }
  0x10   : > { %p357_p10 = scmp.ge.s32.totalorder %s506_s11, 1  ;;  %p122_p11 = scmp.lt.s32.totalorder %s506_s11, 3 }
  0x11   : > { %s101_s28 = scalar_lea.sflag [#allocation3], %s100_s19  ;;  %s508_s29 = smov 256  }
  0x12   : > { %s509_s30 = smov 16   ;;  %p123_p12 = pnand %p357_p10, %p122_p11 }
  0x13   : > { %374 = dma.hbm_to_vmem [thread:$0]  (!%p372_p9), %s113_s25, 512, %s115_s27, %s101_s28, %s508_s29, %s508_s29, %s509_s30  }
  0x14   : > { %126 = sbr.rel (%p123_p12) target bundleno = 70 (0x46), region = 24  ;;  %s128_s2 = sand.u32 (!%p123_p12), 1, %s490_s7  }
  0x15   : > { %s358_s3 = sshll.u32 (!%p123_p12), %s128_s2, 5  ;;  %s129_s4 = scalar_lea.sflag (!%p123_p12), [#allocation3], %s128_s2 }
  0x16   : > { %s132_s5 = scalar_lea.vmem (!%p123_p12), [#allocation2], %s358_s3 }
  0x19   : > { %481 = dma.done.wait (%p563_p7), %s129_s4, 512  }
  0x1a   : > { %483 = vsyncadd (%p563_p7), %s129_s4, 4294966784  ;;  %p158_p13 = scmp.lt.s32.totalorder %s498_s9, 1  ;;  %v171_v0 = vlaneseq  ;;  %v167_v2 = vld [vmem:[%s132_s5] sm:$0xff]  ;;  %v169_v3 = vld [vmem:[%s132_s5 + $0x10] sm:$0xff]  ;;  %vm235_vm1 = vcmask 1040384  }
  0x1b   : > { %v168_v4 = vld [vmem:[%s132_s5 + $0x8] sm:$0xff]  ;;  %v170_v6 = vld [vmem:[%s132_s5 + $0x18] sm:$0xff] }
  0x1c   : > { %s642_s9 = smov (!%p158_p13, %s498_s9), 1  ;;  %v172_v1 = vshrl.u32 %v171_v0, 7  ;;  %vm597_vm7 = vcmp.lt.s32.totalorder %v171_v0, 256 }
  0x1d   : > { %s368_s6 = sshll.u32 %s642_s9, 4 }
  0x1e   : > { %s590_s15 = scalar_lea.vmem %s629_s1, %s368_s6  ;;  %vm174_vm0 = vcmp.ge.s32.totalorder %v172_v1, 4  ;;  %v173_v16 = vadd.s32 8, %v172_v1  ;;  %v361_v24 = vadd.s32 4294967292, %v172_v1 }
  0x1f   : > { %v176_v5 = vsel %vm174_vm0, %v167_v2, -inf  ;;  %230 = vst [vmem:[%s590_s15] sm:$0xf] %v167_v2  ;;  %v177_v7 = vsel %vm174_vm0, %v168_v4, -inf }
  0x20   : > { %v180_v8 = vmax.f32 %v176_v5, %v169_v3  ;;  %v187_v9 = vmax.f32 %v177_v7, %v170_v6  ;;  %231 = vst [vmem:[%s590_s15 + $0x8] sm:$0xf] %v168_v4  ;;  %v362_v21 = vadd.s32 4294967292, %v173_v16 }
  0x22   : > { %v181_v10 = vrot.slane %v180_v8, 4  ;;  %v188_v11 = vrot.slane %v187_v9, 4 }
  0x24   : > { %v182_v12 = vmax.f32 %v180_v8, %v181_v10  ;;  %v189_v13 = vmax.f32 %v187_v9, %v188_v11 }
  0x26   : > { %v183_v14 = vrot.slane %v182_v12, 2  ;;  %v190_v15 = vrot.slane %v189_v13, 2 }
  0x28   : > { %v184_v17 = vmax.f32 %v182_v12, %v183_v14  ;;  %v191_v18 = vmax.f32 %v189_v13, %v190_v15 }
  0x2a   : > { %v185_v19 = vrot.slane %v184_v17, 1  ;;  %v192_v20 = vrot.slane %v191_v18, 1 }
  0x2c   : > { %v186_v22 = vmax.f32 %v184_v17, %v185_v19  ;;  %v193_v23 = vmax.f32 %v191_v18, %v192_v20 }
  0x2e   : > { %vm194_vm2 = vcmp.eq.f32.partialorder %v167_v2, %v186_v22  ;;  %vm196_vm3 = vcmp.eq.f32.partialorder %v169_v3, %v186_v22  ;;  %vm195_vm4 = vcmp.eq.f32.partialorder %v168_v4, %v193_v23  ;;  %vm197_vm5 = vcmp.eq.f32.partialorder %v170_v6, %v193_v23 }
  0x2f   : > { %vm198_vm6 = vmand %vm174_vm0, %vm194_vm2  ;;  %v206_v25 = vsel %vm196_vm3, %v362_v21, 2147483647  ;;  %v207_v26 = vsel %vm197_vm5, %v362_v21, 2147483647  ;;  %v234_v27 = vrot.slane %v193_v23, 7 }
  0x30   : > { %v204_v29 = vsel %vm198_vm6, %v361_v24, 2147483647  ;;  %vm199_vm8 = vmand %vm174_vm0, %vm195_vm4 }
  0x31   : > { %vm208_vm9 = vcmp.lt.s32.totalorder %v204_v29, %v206_v25  ;;  %v205_v30 = vsel %vm199_vm8, %v361_v24, 2147483647  ;;  %v236_v31 = vsel %vm235_vm1, %v186_v22, %v234_v27 }
  0x32   : > { %v209_v32 = vsel %vm208_vm9, %v204_v29, %v206_v25  ;;  %vm219_vm10 = vcmp.lt.s32.totalorder %v205_v30, %v207_v26  ;;  %363 = vst.msk [vmem:[%s590_s15 + $0x4] ss:$8 sm:$0x3] %vm597_vm7, %v236_v31 }
  0x33   : > { %v210_v33 = vrot.slane %v209_v32, 4  ;;  %v220_v34 = vsel %vm219_vm10, %v205_v30, %v207_v26 }
  0x34   : > { %v221_v35 = vrot.slane %v220_v34, 4 }
  0x35   : > { %vm211_vm11 = vcmp.lt.s32.totalorder %v209_v32, %v210_v33 }
  0x36   : > { %v212_v36 = vsel %vm211_vm11, %v209_v32, %v210_v33  ;;  %vm222_vm12 = vcmp.lt.s32.totalorder %v220_v34, %v221_v35 }
  0x37   : > { %v213_v37 = vrot.slane %v212_v36, 2  ;;  %v223_v38 = vsel %vm222_vm12, %v220_v34, %v221_v35 }
  0x38   : > { %v224_v39 = vrot.slane %v223_v38, 2 }
  0x39   : > { %vm214_vm13 = vcmp.lt.s32.totalorder %v212_v36, %v213_v37 }
  0x3a   : > { %vm225_vm14 = vcmp.lt.s32.totalorder %v223_v38, %v224_v39  ;;  %v215_v40 = vsel %vm214_vm13, %v212_v36, %v213_v37 }
  0x3b   : > { %v216_v41 = vrot.slane %v215_v40, 1  ;;  %v226_v42 = vsel %vm225_vm14, %v223_v38, %v224_v39 }
  0x3c   : > { %v227_v43 = vrot.slane %v226_v42, 1 }
  0x3d   : > { %vm217_vm15 = vcmp.lt.s32.totalorder %v215_v40, %v216_v41 }
  0x3e   : > { %v218_v44 = vsel %vm217_vm15, %v215_v40, %v216_v41  ;;  %vm228_vm0 = vcmp.lt.s32.totalorder %v226_v42, %v227_v43 }
  0x3f   : > { %v229_v45 = vsel %vm228_vm0, %v226_v42, %v227_v43  ;;  %v245_v46 = vcvt.s32.f32 %v218_v44 }
  0x40   : > { %v246_v47 = vcvt.s32.f32 %v229_v45 }
  0x42   : > { %v249_v48 = vrot.slane %v246_v47, 7 }
  0x44   : > { %v250_v49 = vsel %vm235_vm1, %v245_v46, %v249_v48 }
  0x45   : > { %364 = vst.msk [vmem:[%s590_s15 + $0x5] ss:$8 sm:$0x3] %vm597_vm7, %v250_v49 }
  0x46 PF: > { %s14_s11 = sadd.s32 1, %s506_s11   ;;  %s634_s6 = smov %s490_s7 }
  0x47   : > { %p11_p0 = scmp.ge.s32.totalorder %s14_s11, 4   ;;  %s635_s7 = smov %s494_s8 }
  0x48   : > { %s636_s8 = smov %s569_s18  ;;  %s637_s9 = smov %s502_s10 }
  0x49   : > { %s638_s10 = smov %s640_s13  ;;  %13 = sbr.rel (!%p11_p0) target bundleno = 4 (0x4), region = 66 }
  0x4e   :  { %285 = vsyncpa [#allocation3], 1 }
  0x4f   :  { %287 = vsyncpa [#allocation3 + $0x1], 1 }

</bundles_post_ra>
